<compile_context>
chip_gen: v7x
topology: tpu7x:2x2x1
jax: 0.10.0
libtpu: 0.0.40
codegen_flags: <defaults>
</compile_context>

<pallas_src>
import functools

import jax
import jax.numpy as jnp
from jax import lax
from jax.experimental import pallas as pl
from jax.experimental.pallas import tpu as pltpu

K = 3          # kernel size (module default)
STRIDE = 1     # stride (module default)
PAD = 1        # padding (module default)
BN_EPS = 1e-5


def _conv_stats_kernel(x_ref, w_ref, y_ref, sum_ref, sumsq_ref, xpad_ref, *, H, W):
    """Per-sample conv3x3(stride1,pad1) + per-sample BN partial statistics.

    x_ref:     (1, Cin, H*W)    flattened NCHW sample (unpadded)      VMEM
    w_ref:     (9, Cout, Cin)   one (Cout, Cin) matrix per tap        VMEM
    y_ref:     (1, Cout, H*W)   conv output, lane-dense, f32          VMEM
    sum_ref:   (1, Cout, 1)     per-sample sum over H*W, f32          VMEM
    sumsq_ref: (1, Cout, 1)     per-sample sum of squares, f32        VMEM
    xpad_ref:  (Cin, L)         scratch: H-padded flat sample, L = 2+(H+2)*W
    """
    Cin = x_ref.shape[1]
    Cout = y_ref.shape[1]
    HW = H * W
    L = xpad_ref.shape[1]
    dt = xpad_ref.dtype

    # Build the H-padded flattened sample in VMEM (padding never touches HBM).
    # Flat index f = 1 + r*W + c, padded row r in [0, H+2), column c in [0, W),
    # plus one guard element at each end so every tap slice start is >= 0.
    xpad_ref[:, : W + 1] = jnp.zeros((Cin, W + 1), dt)
    xpad_ref[:, W + 1 + HW:] = jnp.zeros((Cin, L - (W + 1 + HW)), dt)
    xpad_ref[:, W + 1: W + 1 + HW] = x_ref[0]

    x_mid = xpad_ref[...]                                     # (Cin, L)

    # W-edge handling without materialized W padding: for kw=0 taps the input
    # column c=W-1 is only ever read as a (wrong) wrap-around, for kw=2 taps the
    # same holds for column c=0 — zero each once up front.
    f_idx = lax.broadcasted_iota(jnp.int32, (1, L), 1)
    x_lft = jnp.where(f_idx % W == 0, jnp.zeros((), dt), x_mid)   # zero c == W-1
    x_rgt = jnp.where(f_idx % W == 1, jnp.zeros((), dt), x_mid)   # zero c == 0
    taps_src = (x_lft, x_mid, x_rgt)

    # Conv as 9 accumulating (Cout, Cin) x (Cin, H*W) MXU matmuls; the spatial
    # axis stays on lanes, the kh/kw shifts are static lane-axis slices.
    acc = jnp.zeros((Cout, HW), jnp.float32)
    for kh in range(K):
        for kw in range(K):
            start = kh * W + kw
            tap = taps_src[kw][:, start: start + HW]           # (Cin, H*W)
            acc = acc + jnp.dot(w_ref[kh * K + kw], tap,
                                preferred_element_type=jnp.float32)

    # NOTE: conv bias intentionally dropped — it shifts acc and its batch mean
    # identically, so it cancels exactly under training-mode BatchNorm.

    y_ref[0] = acc                                             # lane-dense store
    sum_ref[0] = jnp.sum(acc, axis=1, keepdims=True)           # (Cout, 1)
    sumsq_ref[0] = jnp.sum(acc * acc, axis=1, keepdims=True)   # (Cout, 1)


def _bn_relu_kernel(y_ref, scale_ref, shift_ref, o_ref):
    """Fused folded-BN (one FMA) + ReLU on lane-dense (Cout, H*W) blocks."""
    o_ref[0] = jnp.maximum(y_ref[0] * scale_ref[...] + shift_ref[...], 0.0)


def conv_block_forward(x_nchw, w_oihw, bias, gamma, beta, *,
                       compute_dtype=jnp.float32):
    """NCHW in / NCHW out, matching PyTorch ConvBlock.forward (training mode)."""
    del bias  # cancels exactly under training-mode BatchNorm (see kernel note)
    N, Cin, H, W = x_nchw.shape
    Cout = w_oihw.shape[0]
    HW = H * W
    L = 2 + (H + 2 * PAD) * W

    # Cheap glue only: NCHW kept (no transpose), reshape is contiguous (free),
    # spatial padding happens inside the kernel.
    x_flat = x_nchw.reshape(N, Cin, HW).astype(compute_dtype)
    # (Cout, Cin, K, K) -> (K*K, Cout, Cin): one (Cout, Cin) matrix per tap.
    w_taps = jnp.transpose(w_oihw, (2, 3, 0, 1)).reshape(K * K, Cout, Cin)
    w_taps = w_taps.astype(compute_dtype)

    cparams = pltpu.CompilerParams(
        dimension_semantics=("parallel",),
        vmem_limit_bytes=32 * 1024 * 1024,   # fits v7x's smaller scoped VMEM too
    )

    conv_flops = 2 * N * HW * K * K * Cin * Cout + 4 * N * Cout * HW
    conv_bytes = (x_flat.size * x_flat.dtype.itemsize
                  + w_taps.size * w_taps.dtype.itemsize
                  + (N * Cout * HW + 2 * N * Cout) * 4)

    kernel1 = functools.partial(_conv_stats_kernel, H=H, W=W)
    y, psum, psumsq = pl.pallas_call(
        kernel1,
        out_shape=(
            jax.ShapeDtypeStruct((N, Cout, HW), jnp.float32),
            jax.ShapeDtypeStruct((N, Cout, 1), jnp.float32),
            jax.ShapeDtypeStruct((N, Cout, 1), jnp.float32),
        ),
        grid_spec=pltpu.PrefetchScalarGridSpec(
            num_scalar_prefetch=0,
            grid=(N,),
            in_specs=[
                pl.BlockSpec((1, Cin, HW), lambda n: (n, 0, 0)),
                pl.BlockSpec((K * K, Cout, Cin), lambda n: (0, 0, 0)),
            ],
            out_specs=(
                pl.BlockSpec((1, Cout, HW), lambda n: (n, 0, 0)),
                pl.BlockSpec((1, Cout, 1), lambda n: (n, 0, 0)),
                pl.BlockSpec((1, Cout, 1), lambda n: (n, 0, 0)),
            ),
            scratch_shapes=[pltpu.VMEM((Cin, L), compute_dtype)],
        ),
        compiler_params=cparams,
        cost_estimate=pl.CostEstimate(
            flops=conv_flops, transcendentals=0, bytes_accessed=conv_bytes),
    )(x_flat, w_taps)

    # Finalize BN (training mode, biased variance) on tiny (Cout,) vectors and
    # fold gamma/beta + normalization into one scale/shift pair.
    cnt = float(N * HW)
    mean = jnp.sum(psum[:, :, 0], axis=0) / cnt
    ex2 = jnp.sum(psumsq[:, :, 0], axis=0) / cnt
    var = jnp.maximum(ex2 - mean * mean, 0.0)
    scale = gamma.astype(jnp.float32) * lax.rsqrt(var + BN_EPS)
    shift = beta.astype(jnp.float32) - mean * scale

    bn_bytes = (2 * N * Cout * HW + 2 * Cout) * 4
    out = pl.pallas_call(
        _bn_relu_kernel,
        out_shape=jax.ShapeDtypeStruct((N, Cout, HW), jnp.float32),
        grid_spec=pltpu.PrefetchScalarGridSpec(
            num_scalar_prefetch=0,
            grid=(N,),
            in_specs=[
                pl.BlockSpec((1, Cout, HW), lambda n: (n, 0, 0)),
                pl.BlockSpec((Cout, 1), lambda n: (0, 0)),
                pl.BlockSpec((Cout, 1), lambda n: (0, 0)),
            ],
            out_specs=pl.BlockSpec((1, Cout, HW), lambda n: (n, 0, 0)),
        ),
        compiler_params=cparams,
        cost_estimate=pl.CostEstimate(
            flops=3 * N * Cout * HW, transcendentals=0, bytes_accessed=bn_bytes),
    )(y, scale.reshape(Cout, 1), shift.reshape(Cout, 1))

    return out.reshape(N, Cout, H, W)   # contiguous reshape (free), stays NCHW


def reference_forward(x_nchw, w_oihw, bias, gamma, beta):
    """Pure-JAX reference matching PyTorch ConvBlock.forward (training mode)."""
    y = lax.conv_general_dilated(
        x_nchw, w_oihw, window_strides=(STRIDE, STRIDE),
        padding=((PAD, PAD), (PAD, PAD)),
        dimension_numbers=("NCHW", "OIHW", "NCHW"))
    y = y + bias.reshape(1, -1, 1, 1)
    mean = jnp.mean(y, axis=(0, 2, 3), keepdims=True)
    var = jnp.mean((y - mean) ** 2, axis=(0, 2, 3), keepdims=True)
    y = (y - mean) * lax.rsqrt(var + BN_EPS)
    y = y * gamma.reshape(1, -1, 1, 1) + beta.reshape(1, -1, 1, 1)
    return jnp.maximum(y, 0.0)


if __name__ == "__main__":
    # Small shapes consistent with the module: in_n=4, out_n=8, NCHW input.
    N, Cin, H, W = 2, 4, 16, 16
    Cout = 8

    key = jax.random.PRNGKey(0)
    kx, kwt, kb = jax.random.split(key, 3)

    x = jax.random.normal(kx, (N, Cin, H, W), dtype=jnp.float32)
    fan_in = Cin * K * K
    w = jax.random.uniform(kwt, (Cout, Cin, K, K), dtype=jnp.float32,
                           minval=-1.0, maxval=1.0) / jnp.sqrt(float(fan_in))
    b = jax.random.uniform(kb, (Cout,), dtype=jnp.float32,
                           minval=-1.0, maxval=1.0) / jnp.sqrt(float(fan_in))
    gamma = jnp.ones((Cout,), dtype=jnp.float32)
    beta = jnp.zeros((Cout,), dtype=jnp.float32)

    ref = reference_forward(x, w, b, gamma, beta)

    # fp32 MXU inputs: strict check against the fp32 PyTorch-style reference.
    out = jax.block_until_ready(conv_block_forward(x, w, b, gamma, beta))
    assert out.shape == (N, Cout, H, W), out.shape
    assert jnp.allclose(out, ref, rtol=1e-4, atol=1e-4), (
        float(jnp.max(jnp.abs(out - ref))))

    # bf16 MXU inputs (recommended on v6e/v7x): fp32 accumulation + fp32 BN
    # stats; looser tolerance since the inputs themselves are bf16-rounded.
    out_bf16 = jax.block_until_ready(
        conv_block_forward(x, w, b, gamma, beta, compute_dtype=jnp.bfloat16))
    assert jnp.allclose(out_bf16, ref, rtol=3e-2, atol=3e-2), (
        float(jnp.max(jnp.abs(out_bf16 - ref))))

    print("KERNEL_OK")
</pallas_src>

<mosaic_0001>
module attributes {stable_mosaic.version = 11 : i64} {
  func.func @_conv_stats_kernel(%arg0: i32, %arg1: memref<1x4x256xf32, #tpu.memory_space<vmem>>, %arg2: memref<9x8x4xf32, #tpu.memory_space<vmem>>, %arg3: memref<1x8x256xf32, #tpu.memory_space<vmem>>, %arg4: memref<1x8x1xf32, #tpu.memory_space<vmem>>, %arg5: memref<1x8x1xf32, #tpu.memory_space<vmem>>, %arg6: memref<4x290xf32, #tpu.memory_space<vmem>>) attributes {dimension_semantics = [#tpu.dimension_semantics<parallel>], iteration_bounds = array<i64: 2>, scalar_prefetch = 0 : i64, scratch_operands = 1 : i64, tpu.core_type = #tpu.core_type<tc>, window_params = [{transform_indices = @transform_0, window_bounds = array<i64: 1, 4, 256>}, {pipeline_mode = #tpu.pipeline_mode<synchronous>, transform_indices = @transform_1, window_bounds = array<i64: 9, 8, 4>}, {transform_indices = @transform_2, window_bounds = array<i64: 1, 8, 256>}, {transform_indices = @transform_3, window_bounds = array<i64: 1, 8, 1>}, {transform_indices = @transform_4, window_bounds = array<i64: 1, 8, 1>}]} {
    %cst = arith.constant 0.000000e+00 : f32
    %0 = vector.broadcast %cst : f32 to vector<4x17xf32>
    %c0 = arith.constant 0 : index
    %c0_0 = arith.constant 0 : index
    %1 = vector.load %arg6[%c0, %c0_0] : memref<4x290xf32, #tpu.memory_space<vmem>>, vector<4x17xf32>
    tpu.vector_store %arg6[%c0, %c0_0], %0 {strides = array<i32>} : memref<4x290xf32, #tpu.memory_space<vmem>>, vector<4x17xf32>,
    %cst_1 = arith.constant 0.000000e+00 : f32
    %2 = vector.broadcast %cst_1 : f32 to vector<4x17xf32>
    %c0_2 = arith.constant 0 : index
    %c273 = arith.constant 273 : index
    %3 = vector.load %arg6[%c0_2, %c273] : memref<4x290xf32, #tpu.memory_space<vmem>>, vector<4x17xf32>
    tpu.vector_store %arg6[%c0_2, %c273], %2 {strides = array<i32>} : memref<4x290xf32, #tpu.memory_space<vmem>>, vector<4x17xf32>,
    %c0_3 = arith.constant 0 : index
    %c0_4 = arith.constant 0 : index
    %c0_5 = arith.constant 0 : index
    %4 = vector.load %arg1[%c0_3, %c0_4, %c0_5] : memref<1x4x256xf32, #tpu.memory_space<vmem>>, vector<1x4x256xf32>
    %5 = vector.shape_cast %4 : vector<1x4x256xf32> to vector<4x256xf32>
    %c0_6 = arith.constant 0 : index
    %c17 = arith.constant 17 : index
    %6 = vector.load %arg6[%c0_6, %c17] : memref<4x290xf32, #tpu.memory_space<vmem>>, vector<4x256xf32>
    tpu.vector_store %arg6[%c0_6, %c17], %5 {strides = array<i32>} : memref<4x290xf32, #tpu.memory_space<vmem>>, vector<4x256xf32>,
    %c0_7 = arith.constant 0 : index
    %c0_8 = arith.constant 0 : index
    %7 = vector.load %arg6[%c0_7, %c0_8] : memref<4x290xf32, #tpu.memory_space<vmem>>, vector<4x290xf32>
    %8 = tpu.iota {dimensions = array<i32: 1>} : vector<1x290xi32>
    %c16_i32 = arith.constant 16 : i32
    %c0_i32 = arith.constant 0 : i32
    %9 = arith.cmpi eq, %c16_i32, %c0_i32 : i32
    %c1_i32 = arith.constant 1 : i32
    %10 = arith.select %9, %c1_i32, %c16_i32 : i32
    %11 = vector.broadcast %10 : i32 to vector<1x290xi32>
    %12 = arith.remsi %8, %11 : vector<1x290xi32>
    %c0_i32_9 = arith.constant 0 : i32
    %13 = vector.broadcast %c0_i32_9 : i32 to vector<1x290xi32>
    %14 = arith.cmpi ne, %12, %13 : vector<1x290xi32>
    %c0_i32_10 = arith.constant 0 : i32
    %15 = vector.broadcast %c0_i32_10 : i32 to vector<1x290xi32>
    %16 = arith.cmpi slt, %12, %15 : vector<1x290xi32>
    %c0_i32_11 = arith.constant 0 : i32
    %17 = arith.cmpi slt, %10, %c0_i32_11 : i32
    %18 = vector.broadcast %17 : i1 to vector<1x290xi1>
    %19 = vector.broadcast %18 : vector<1x290xi1> to vector<1x290xi1>
    %20 = arith.xori %16, %19 : vector<1x290xi1>
    %21 = arith.andi %20, %14 : vector<1x290xi1>
    %22 = vector.broadcast %10 : i32 to vector<1x290xi32>
    %23 = arith.addi %12, %22 : vector<1x290xi32>
    %24 = arith.select %21, %23, %12 : vector<1x290xi1>, vector<1x290xi32>
    %c0_i32_12 = arith.constant 0 : i32
    %25 = vector.broadcast %c0_i32_12 : i32 to vector<1x290xi32>
    %26 = arith.cmpi eq, %24, %25 : vector<1x290xi32>
    %cst_13 = arith.constant 0.000000e+00 : f32
    %27 = vector.shape_cast %26 : vector<1x290xi1> to vector<1x290xi1>
    %28 = vector.broadcast %27 : vector<1x290xi1> to vector<4x290xi1>
    %29 = vector.broadcast %cst_13 : f32 to vector<4x290xf32>
    %30 = arith.select %28, %29, %7 : vector<4x290xi1>, vector<4x290xf32>
    %c16_i32_14 = arith.constant 16 : i32
    %c0_i32_15 = arith.constant 0 : i32
    %31 = arith.cmpi eq, %c16_i32_14, %c0_i32_15 : i32
    %c1_i32_16 = arith.constant 1 : i32
    %32 = arith.select %31, %c1_i32_16, %c16_i32_14 : i32
    %33 = vector.broadcast %32 : i32 to vector<1x290xi32>
    %34 = arith.remsi %8, %33 : vector<1x290xi32>
    %c0_i32_17 = arith.constant 0 : i32
    %35 = vector.broadcast %c0_i32_17 : i32 to vector<1x290xi32>
    %36 = arith.cmpi ne, %34, %35 : vector<1x290xi32>
    %c0_i32_18 = arith.constant 0 : i32
    %37 = vector.broadcast %c0_i32_18 : i32 to vector<1x290xi32>
    %38 = arith.cmpi slt, %34, %37 : vector<1x290xi32>
    %c0_i32_19 = arith.constant 0 : i32
    %39 = arith.cmpi slt, %32, %c0_i32_19 : i32
    %40 = vector.broadcast %39 : i1 to vector<1x290xi1>
    %41 = vector.broadcast %40 : vector<1x290xi1> to vector<1x290xi1>
    %42 = arith.xori %38, %41 : vector<1x290xi1>
    %43 = arith.andi %42, %36 : vector<1x290xi1>
    %44 = vector.broadcast %32 : i32 to vector<1x290xi32>
    %45 = arith.addi %34, %44 : vector<1x290xi32>
    %46 = arith.select %43, %45, %34 : vector<1x290xi1>, vector<1x290xi32>
    %c1_i32_20 = arith.constant 1 : i32
    %47 = vector.broadcast %c1_i32_20 : i32 to vector<1x290xi32>
    %48 = arith.cmpi eq, %46, %47 : vector<1x290xi32>
    %cst_21 = arith.constant 0.000000e+00 : f32
    %49 = vector.shape_cast %48 : vector<1x290xi1> to vector<1x290xi1>
    %50 = vector.broadcast %49 : vector<1x290xi1> to vector<4x290xi1>
    %51 = vector.broadcast %cst_21 : f32 to vector<4x290xf32>
    %52 = arith.select %50, %51, %7 : vector<4x290xi1>, vector<4x290xf32>
    %cst_22 = arith.constant 0.000000e+00 : f32
    %53 = vector.broadcast %cst_22 : f32 to vector<8x256xf32>
    %54 = vector.extract_strided_slice %30 {offsets = [0, 0], sizes = [4, 256], strides = [1, 1]} : vector<4x290xf32> to vector<4x256xf32>
    %c0_23 = arith.constant 0 : index
    %c0_24 = arith.constant 0 : index
    %c0_25 = arith.constant 0 : index
    %55 = vector.load %arg2[%c0_23, %c0_24, %c0_25] : memref<9x8x4xf32, #tpu.memory_space<vmem>>, vector<1x8x4xf32>
    %56 = vector.shape_cast %55 : vector<1x8x4xf32> to vector<8x4xf32>
    %cst_26 = arith.constant dense<0.000000e+00> : vector<8x256xf32>
    %57 = tpu.matmul %56, %54, %cst_26 {dimension_numbers = #tpu.dot_dimension_numbers<[1], [0], [0], [1], [0, 0, 1, 1], [], []>} : vector<8x4xf32>, vector<4x256xf32>, vector<8x256xf32> -> vector<8x256xf32>
    %58 = arith.addf %53, %57 : vector<8x256xf32>
    %59 = vector.extract_strided_slice %7 {offsets = [0, 1], sizes = [4, 256], strides = [1, 1]} : vector<4x290xf32> to vector<4x256xf32>
    %c1 = arith.constant 1 : index
    %c0_27 = arith.constant 0 : index
    %c0_28 = arith.constant 0 : index
    %60 = vector.load %arg2[%c1, %c0_27, %c0_28] : memref<9x8x4xf32, #tpu.memory_space<vmem>>, vector<1x8x4xf32>
    %61 = vector.shape_cast %60 : vector<1x8x4xf32> to vector<8x4xf32>
    %cst_29 = arith.constant dense<0.000000e+00> : vector<8x256xf32>
    %62 = tpu.matmul %61, %59, %cst_29 {dimension_numbers = #tpu.dot_dimension_numbers<[1], [0], [0], [1], [0, 0, 1, 1], [], []>} : vector<8x4xf32>, vector<4x256xf32>, vector<8x256xf32> -> vector<8x256xf32>
    %63 = arith.addf %58, %62 : vector<8x256xf32>
    %64 = vector.extract_strided_slice %52 {offsets = [0, 2], sizes = [4, 256], strides = [1, 1]} : vector<4x290xf32> to vector<4x256xf32>
    %c2 = arith.constant 2 : index
    %c0_30 = arith.constant 0 : index
    %c0_31 = arith.constant 0 : index
    %65 = vector.load %arg2[%c2, %c0_30, %c0_31] : memref<9x8x4xf32, #tpu.memory_space<vmem>>, vector<1x8x4xf32>
    %66 = vector.shape_cast %65 : vector<1x8x4xf32> to vector<8x4xf32>
    %cst_32 = arith.constant dense<0.000000e+00> : vector<8x256xf32>
    %67 = tpu.matmul %66, %64, %cst_32 {dimension_numbers = #tpu.dot_dimension_numbers<[1], [0], [0], [1], [0, 0, 1, 1], [], []>} : vector<8x4xf32>, vector<4x256xf32>, vector<8x256xf32> -> vector<8x256xf32>
    %68 = arith.addf %63, %67 : vector<8x256xf32>
    %69 = vector.extract_strided_slice %30 {offsets = [0, 16], sizes = [4, 256], strides = [1, 1]} : vector<4x290xf32> to vector<4x256xf32>
    %c3 = arith.constant 3 : index
    %c0_33 = arith.constant 0 : index
    %c0_34 = arith.constant 0 : index
    %70 = vector.load %arg2[%c3, %c0_33, %c0_34] : memref<9x8x4xf32, #tpu.memory_space<vmem>>, vector<1x8x4xf32>
    %71 = vector.shape_cast %70 : vector<1x8x4xf32> to vector<8x4xf32>
    %cst_35 = arith.constant dense<0.000000e+00> : vector<8x256xf32>
    %72 = tpu.matmul %71, %69, %cst_35 {dimension_numbers = #tpu.dot_dimension_numbers<[1], [0], [0], [1], [0, 0, 1, 1], [], []>} : vector<8x4xf32>, vector<4x256xf32>, vector<8x256xf32> -> vector<8x256xf32>
    %73 = arith.addf %68, %72 : vector<8x256xf32>
    %74 = vector.extract_strided_slice %7 {offsets = [0, 17], sizes = [4, 256], strides = [1, 1]} : vector<4x290xf32> to vector<4x256xf32>
    %c4 = arith.constant 4 : index
    %c0_36 = arith.constant 0 : index
    %c0_37 = arith.constant 0 : index
    %75 = vector.load %arg2[%c4, %c0_36, %c0_37] : memref<9x8x4xf32, #tpu.memory_space<vmem>>, vector<1x8x4xf32>
    %76 = vector.shape_cast %75 : vector<1x8x4xf32> to vector<8x4xf32>
    %cst_38 = arith.constant dense<0.000000e+00> : vector<8x256xf32>
    %77 = tpu.matmul %76, %74, %cst_38 {dimension_numbers = #tpu.dot_dimension_numbers<[1], [0], [0], [1], [0, 0, 1, 1], [], []>} : vector<8x4xf32>, vector<4x256xf32>, vector<8x256xf32> -> vector<8x256xf32>
    %78 = arith.addf %73, %77 : vector<8x256xf32>
    %79 = vector.extract_strided_slice %52 {offsets = [0, 18], sizes = [4, 256], strides = [1, 1]} : vector<4x290xf32> to vector<4x256xf32>
    %c5 = arith.constant 5 : index
    %c0_39 = arith.constant 0 : index
    %c0_40 = arith.constant 0 : index
    %80 = vector.load %arg2[%c5, %c0_39, %c0_40] : memref<9x8x4xf32, #tpu.memory_space<vmem>>, vector<1x8x4xf32>
    %81 = vector.shape_cast %80 : vector<1x8x4xf32> to vector<8x4xf32>
    %cst_41 = arith.constant dense<0.000000e+00> : vector<8x256xf32>
    %82 = tpu.matmul %81, %79, %cst_41 {dimension_numbers = #tpu.dot_dimension_numbers<[1], [0], [0], [1], [0, 0, 1, 1], [], []>} : vector<8x4xf32>, vector<4x256xf32>, vector<8x256xf32> -> vector<8x256xf32>
    %83 = arith.addf %78, %82 : vector<8x256xf32>
    %84 = vector.extract_strided_slice %30 {offsets = [0, 32], sizes = [4, 256], strides = [1, 1]} : vector<4x290xf32> to vector<4x256xf32>
    %c6 = arith.constant 6 : index
    %c0_42 = arith.constant 0 : index
    %c0_43 = arith.constant 0 : index
    %85 = vector.load %arg2[%c6, %c0_42, %c0_43] : memref<9x8x4xf32, #tpu.memory_space<vmem>>, vector<1x8x4xf32>
    %86 = vector.shape_cast %85 : vector<1x8x4xf32> to vector<8x4xf32>
    %cst_44 = arith.constant dense<0.000000e+00> : vector<8x256xf32>
    %87 = tpu.matmul %86, %84, %cst_44 {dimension_numbers = #tpu.dot_dimension_numbers<[1], [0], [0], [1], [0, 0, 1, 1], [], []>} : vector<8x4xf32>, vector<4x256xf32>, vector<8x256xf32> -> vector<8x256xf32>
    %88 = arith.addf %83, %87 : vector<8x256xf32>
    %89 = vector.extract_strided_slice %7 {offsets = [0, 33], sizes = [4, 256], strides = [1, 1]} : vector<4x290xf32> to vector<4x256xf32>
    %c7 = arith.constant 7 : index
    %c0_45 = arith.constant 0 : index
    %c0_46 = arith.constant 0 : index
    %90 = vector.load %arg2[%c7, %c0_45, %c0_46] : memref<9x8x4xf32, #tpu.memory_space<vmem>>, vector<1x8x4xf32>
    %91 = vector.shape_cast %90 : vector<1x8x4xf32> to vector<8x4xf32>
    %cst_47 = arith.constant dense<0.000000e+00> : vector<8x256xf32>
    %92 = tpu.matmul %91, %89, %cst_47 {dimension_numbers = #tpu.dot_dimension_numbers<[1], [0], [0], [1], [0, 0, 1, 1], [], []>} : vector<8x4xf32>, vector<4x256xf32>, vector<8x256xf32> -> vector<8x256xf32>
    %93 = arith.addf %88, %92 : vector<8x256xf32>
    %94 = vector.extract_strided_slice %52 {offsets = [0, 34], sizes = [4, 256], strides = [1, 1]} : vector<4x290xf32> to vector<4x256xf32>
    %c8 = arith.constant 8 : index
    %c0_48 = arith.constant 0 : index
    %c0_49 = arith.constant 0 : index
    %95 = vector.load %arg2[%c8, %c0_48, %c0_49] : memref<9x8x4xf32, #tpu.memory_space<vmem>>, vector<1x8x4xf32>
    %96 = vector.shape_cast %95 : vector<1x8x4xf32> to vector<8x4xf32>
    %cst_50 = arith.constant dense<0.000000e+00> : vector<8x256xf32>
    %97 = tpu.matmul %96, %94, %cst_50 {dimension_numbers = #tpu.dot_dimension_numbers<[1], [0], [0], [1], [0, 0, 1, 1], [], []>} : vector<8x4xf32>, vector<4x256xf32>, vector<8x256xf32> -> vector<8x256xf32>
    %98 = arith.addf %93, %97 : vector<8x256xf32>
    %c0_51 = arith.constant 0 : index
    %c0_52 = arith.constant 0 : index
    %c0_53 = arith.constant 0 : index
    %99 = vector.load %arg3[%c0_51, %c0_52, %c0_53] : memref<1x8x256xf32, #tpu.memory_space<vmem>>, vector<1x8x256xf32>
    %100 = vector.shape_cast %99 : vector<1x8x256xf32> to vector<8x256xf32>
    %101 = vector.shape_cast %98 : vector<8x256xf32> to vector<1x8x256xf32>
    tpu.vector_store %arg3[%c0_51, %c0_52, %c0_53], %101 {strides = array<i32>} : memref<1x8x256xf32, #tpu.memory_space<vmem>>, vector<1x8x256xf32>,
    %cst_54 = arith.constant dense<0.000000e+00> : vector<8xf32>
    %102 = vector.multi_reduction <add>, %98, %cst_54 [1] : vector<8x256xf32> to vector<8xf32>
    %103 = vector.shape_cast %102 : vector<8xf32> to vector<8x1xf32>
    %c0_55 = arith.constant 0 : index
    %c0_56 = arith.constant 0 : index
    %c0_57 = arith.constant 0 : index
    %104 = vector.load %arg4[%c0_55, %c0_56, %c0_57] : memref<1x8x1xf32, #tpu.memory_space<vmem>>, vector<1x8x1xf32>
    %105 = vector.shape_cast %104 : vector<1x8x1xf32> to vector<8x1xf32>
    %106 = vector.shape_cast %103 : vector<8x1xf32> to vector<1x8x1xf32>
    tpu.vector_store %arg4[%c0_55, %c0_56, %c0_57], %106 {strides = array<i32>} : memref<1x8x1xf32, #tpu.memory_space<vmem>>, vector<1x8x1xf32>,
    %107 = arith.mulf %98, %98 : vector<8x256xf32>
    %cst_58 = arith.constant dense<0.000000e+00> : vector<8xf32>
    %108 = vector.multi_reduction <add>, %107, %cst_58 [1] : vector<8x256xf32> to vector<8xf32>
    %109 = vector.shape_cast %108 : vector<8xf32> to vector<8x1xf32>
    %c0_59 = arith.constant 0 : index
    %c0_60 = arith.constant 0 : index
    %c0_61 = arith.constant 0 : index
    %110 = vector.load %arg5[%c0_59, %c0_60, %c0_61] : memref<1x8x1xf32, #tpu.memory_space<vmem>>, vector<1x8x1xf32>
    %111 = vector.shape_cast %110 : vector<1x8x1xf32> to vector<8x1xf32>
    %112 = vector.shape_cast %109 : vector<8x1xf32> to vector<1x8x1xf32>
    tpu.vector_store %arg5[%c0_59, %c0_60, %c0_61], %112 {strides = array<i32>} : memref<1x8x1xf32, #tpu.memory_space<vmem>>, vector<1x8x1xf32>,
    return
  }
  func.func @transform_0(%arg0: i32) -> (i32, i32, i32) {
    %c0_i32 = arith.constant 0 : i32
    %c0_i32_0 = arith.constant 0 : i32
    %c0_i32_1 = arith.constant 0 : i32
    return %arg0, %c0_i32, %c0_i32_0 : i32, i32, i32
  }
  func.func @transform_1(%arg0: i32) -> (i32, i32, i32) {
    %c0_i32 = arith.constant 0 : i32
    %c0_i32_0 = arith.constant 0 : i32
    %c0_i32_1 = arith.constant 0 : i32
    %c0_i32_2 = arith.constant 0 : i32
    return %c0_i32, %c0_i32_0, %c0_i32_1 : i32, i32, i32
  }
  func.func @transform_2(%arg0: i32) -> (i32, i32, i32) {
    %c0_i32 = arith.constant 0 : i32
    %c0_i32_0 = arith.constant 0 : i32
    %c0_i32_1 = arith.constant 0 : i32
    return %arg0, %c0_i32, %c0_i32_0 : i32, i32, i32
  }
  func.func @transform_3(%arg0: i32) -> (i32, i32, i32) {
    %c0_i32 = arith.constant 0 : i32
    %c0_i32_0 = arith.constant 0 : i32
    %c0_i32_1 = arith.constant 0 : i32
    return %arg0, %c0_i32, %c0_i32_0 : i32, i32, i32
  }
  func.func @transform_4(%arg0: i32) -> (i32, i32, i32) {
    %c0_i32 = arith.constant 0 : i32
    %c0_i32_0 = arith.constant 0 : i32
    %c0_i32_1 = arith.constant 0 : i32
    return %arg0, %c0_i32, %c0_i32_0 : i32, i32, i32
  }
}

</mosaic_0001>

<bundles_post_ra>
// kernel: tpu_custom_call.1
= control target key start
LH: loop header
LB: loop body
LE: loop exit
PB: predicated region body
PF: predicated region fallthrough
CT: control target
= control target key end

     0   :  { %10 = vsyncpa [#allocation4], 0  ;;  %s1663_s0 = inlined_call_operand.vmem [shape: f32[2,4,256], index: 0, kind: input, shape index: {}]   ;;  %s1664_s1 = inlined_call_operand.vmem [shape: f32[9,8,4], index: 1, kind: input, shape index: {}]   ;;  %s1665_s2 = inlined_call_operand.hbm [shape: f32[2,8,256], index: 2, kind: output, shape index: {0}]   ;;  %s1666_s3 = inlined_call_operand.vmem [shape: f32[2,8,1], index: 3, kind: output, shape index: {1}]   ;;  %s1667_s4 = inlined_call_operand.vmem [shape: f32[2,8,1], index: 4, kind: output, shape index: {2}]  }
   0x1   :  { %12 = vsyncpa [#allocation4 + $0x1], 0  ;;  %s1484_s15 = smov 0   ;;  %s1486_s16 = smov 0  }
   0x2   :  { %s1488_s17 = smov 0   ;;  %s1490_s18 = smov 0  }
   0x3 LB: > { %s1505_s19 = sadd.s32 4294967295, %s1446_s18   ;;  %s1267_s20 = sadd.s32 4294967294, %s1446_s18   ;;  %s1446_s18 = sphi %s1490_s18, %s1673_s18   ;;  %s1442_s17 = sphi %s1488_s17, %s1672_s17   ;;  %s1438_s16 = sphi %s1486_s16, %s1671_s16   ;;  %s1434_s15 = sphi %s1484_s15, %s1670_s15  }
   0x4   : > { %s1509_s21 = sadd.s32 1, %s1446_s18   ;;  %s72_s22 = sadd.s32 1, %s1442_s17 }
   0x5   : > { %s69_s23 = ssub.s32 %s1446_s18, %s1509_s21  ;;  %p82_p0 = scmp.ne.s32.totalorder %s1442_s17, %s1438_s16 }
   0x6   : > { %p70_p1 = scmp.eq.s32.totalorder %s69_s23, 0  ;;  %p83_p2 = scmp.eq.s32.totalorder %s1505_s19, 1 }
   0x7   : > { %p88_p3 = scmp.ne.s32.totalorder %s1438_s16, %s1434_s15  ;;  %p89_p4 = scmp.eq.s32.totalorder %s1267_s20, 1 }
   0x8   : > { %s1520_s24 = scalar_select %p70_p1, %s1442_s17, %s72_s22  }
   0x9   : > { %p1522_p5 = por %p83_p2, %p82_p0  ;;  %p1526_p6 = por %p89_p4, %p88_p3 }
   0xa   : > { %p1270_p7 = scmp.ge.s32.totalorder %s1446_s18, 1  ;;  %p170_p8 = scmp.lt.s32.totalorder %s1446_s18, 3 }
   0xc   : > { %p171_p9 = pnand %p1270_p7, %p170_p8 }
   0xd   : > { %p204_p10 = scmp.lt.s32.totalorder (!%p171_p9), %s1505_s19, 1  ;;  %vm217_vm0 = vcmask (!%p171_p9), 134144   ;;  %vm219_vm1 = vcmask (!%p171_p9), 273544   ;;  %v1448_v0 = vmov (!%p171_p9), 0.0   ;;  %s1449_s6 = smov (!%p171_p9), 17   ;;  %vm230_vm2 = vcmask (!%p171_p9), 1043592  }
   0xe   : > { %174 = sbr.rel (%p171_p9) target bundleno = 675 (0x2a3), region = 28  ;;  %218 = vst.msk [vmem:[#allocation2] sm:$0xf] (!%p171_p9), %vm217_vm0, %v1448_v0  ;;  %745 = vmatprep.mubr.f32.mxu0 (!%p171_p9), %v1448_v0  ;;  %390 = vmatprep.mubr.f32.mxu1 (!%p171_p9), %v1448_v0  ;;  %vm231_vm3 = vcmask (!%p171_p9), 1047556   ;;  %vm226_vm4 = vcmask (!%p171_p9), 138240   ;;  %v237_v4 = vlaneseq (!%p171_p9)  ;;  %s1450_s7 = smov (!%p171_p9), 111  }
   0xf   : > { %220 = vst.msk [vmem:[#allocation2 + $0x8] sm:$0xf] (!%p171_p9), %vm219_vm1, %v1448_v0  ;;  %vm232_vm5 = vmor (!%p171_p9), %vm231_vm3, %vm230_vm2  ;;  %s1451_s8 = smov (!%p171_p9), 127   ;;  %s1452_s9 = smov (!%p171_p9), 96   ;;  %vm671_vm12 = vcmask (!%p171_p9), 908288   ;;  %vm321_vm13 = vcmask (!%p171_p9), 1043456  }
  0x10   : > { %v238_v6 = vand.u32 (!%p171_p9), 127, %v237_v4  ;;  %s1453_s10 = smov (!%p171_p9), 110   ;;  %s1454_s11 = smov (!%p171_p9), 126   ;;  %vm317_vm14 = vcmask (!%p171_p9), 31744   ;;  %v1291_v29 = vld [vmem:[%s1664_s1 + $0x20] sm:$0xff] (!%p171_p9)  ;;  %vm314_vm15 = vcmask (!%p171_p9), 1039360  }
  0x11   : > { %s1455_s12 = smov (!%p171_p9), 95   ;;  %s1456_s13 = smov (!%p171_p9), 112   ;;  %v1276_v34 = vld [vmem:[%s1664_s1 + $0x8] sm:$0xff] (!%p171_p9)  ;;  %v305_v42 = vld [vmem:[%s1664_s1] sm:$0xff] (!%p171_p9)  ;;  %vm853_vm1 = vcmask (!%p171_p9), 785408   ;;  %vm944_vm2 = vcmask (!%p171_p9), 777216  }
  0x12   : > { %v245_v7 = vand.u32 (!%p171_p9), 15, %v238_v6  ;;  %v240_v10 = vadd.s32 (!%p171_p9), 256, %v238_v6  ;;  %v239_v13 = vadd.s32 (!%p171_p9), 128, %v238_v6  ;;  %s1457_s14 = smov (!%p171_p9), 94   ;;  %v1295_v39 = vld [vmem:[%s1664_s1 + $0x28] sm:$0xff] (!%p171_p9)  ;;  %v1299_v48 = vld [vmem:[%s1664_s1 + $0x30] sm:$0xff] (!%p171_p9) }
  0x13   : > { %vm488_vm3 = vcmask (!%p171_p9), 1031168   ;;  %v1283_v55 = vld [vmem:[%s1664_s1 + $0x10] sm:$0xff] (!%p171_p9)  ;;  %v1303_v58 = vld [vmem:[%s1664_s1 + $0x38] sm:$0xff] (!%p171_p9)  ;;  %s189_s23 = sand.u32 (!%p171_p9), 1, %s1438_s16   ;;  %s1317_s30 = sshll.u32 (!%p171_p9), %s1505_s19, 8 }
  0x14   : > { %vm277_vm6 = vcmp.eq.s32.totalorder (!%p171_p9), %v245_v7, 0  ;;  %v259_v12 = vand.u32 (!%p171_p9), 15, %v240_v10  ;;  %v252_v15 = vand.u32 (!%p171_p9), 15, %v239_v13  ;;  %vm293_vm10 = vcmp.eq.s32.totalorder (!%p171_p9), %v245_v7, 1 }
  0x15   : > { %s205_s27 = scalar_select %p204_p10, %s1505_s19, 1 }
  0x16   : > { %vm295_vm7 = vcmp.eq.s32.totalorder %v259_v12, 1  ;;  %vm279_vm8 = vcmp.eq.s32.totalorder %v259_v12, 0  ;;  %vm294_vm9 = vcmp.eq.s32.totalorder %v252_v15, 1  ;;  %vm278_vm11 = vcmp.eq.s32.totalorder %v252_v15, 0 }
  0x17   : > { %s1539_s28 = sshll.u32 %s205_s27, 3  ;;  %s1271_s27 = sshll.u32 %s189_s23, 4 }
  0x18   : > { %s208_s5 = scalar_lea.vmem %s1663_s0, %s1539_s28  ;;  %s191_s29 = scalar_lea.vmem [#allocation3], %s1271_s27 }
  0x19   : > { %v221_v1 = vld [vmem:[%s208_s5] sm:$0xff] }
  0x1a   : > { %223 = vrot.lane.b32.xlu0 %v221_v1, %s1449_s6 }
  0x8c   : > { %v224_v2 = vpop.permute.xlu0 %223 }
  0x8d   : > { %v225_v3 = vrot.slane %v224_v2, 4 }
  0x8f   : > { %v227_v5 = vsel %vm226_vm4, %v225_v3, %v224_v2  ;;  %234 = vst.msk [vmem:[#allocation2 + $0x8] sm:$0xf] %vm217_vm0, %v225_v3  ;;  %vm762_vm0 = vcmask 900096   ;;  %vm580_vm4 = vcmask 916480   ;;  %v1287_v2 = vld [vmem:[%s1664_s1 + $0x18] sm:$0xff] }
  0x90   : > { %233 = vst.msk [vmem:[#allocation2] sm:$0xff] %vm232_vm5, %v227_v5  ;;  %vm1035_vm5 = vcmask 769024   ;;  %v1307_v5 = vld [vmem:[%s1664_s1 + $0x40] sm:$0xff] }
  0x96   : > { %v236_v8 = vld [vmem:[#allocation2 + $0x8] sm:$0xf] }
  0x97   : > { %669 = vrot.lane.b32.xlu1 %v236_v8, %s1450_s7  ;;  %v235_v9 = vld [vmem:[#allocation2] sm:$0xff]  ;;  %v304_v16 = vsel %vm295_vm7, 0.0, %v236_v8  ;;  %v292_v17 = vsel %vm279_vm8, 0.0, %v236_v8 }
  0x98   : > { %308 = vrot.lane.b32.xlu0 %v235_v9, %s1451_s8  ;;  %v1546_v11 = vsel %vm277_vm6, 0.0, %v235_v9  ;;  %v288_v14 = vcombine.high %v235_v9, %v235_v9  ;;  %v302_v19 = vsel %vm293_vm10, 0.0, %v235_v9 }
  0x9a   : > { %v303_v18 = vsel %vm294_vm9, 0.0, %v288_v14  ;;  %v291_v20 = vsel %vm278_vm11, 0.0, %v288_v14 }
  0x9b   : > { %312 = vrot.lane.b32.xlu1 %v236_v8, %s1451_s8 }
  0x9c   : > { %847 = vrot.lane.b32.xlu0 %v1546_v11, %s1452_s9 }
  0x9f   : > { %665 = vrot.lane.b32.xlu1 %v235_v9, %s1450_s7 }
  0xa0   : > { %667 = vrot.lane.b32.xlu0 %v288_v14, %s1450_s7  ;;  %s1619_s7 = scalar_lea.hbm %s1665_s2, %s1317_s30 }
  0xa3   : > { %760 = vrot.lane.b32.xlu1 %v304_v16, %s1453_s10 }
  0xa4   : > { %310 = vrot.lane.b32.xlu0 %v288_v14, %s1451_s8  ;;  %s1154_s8 = sshll.u32 %s191_s29, 4  ;;  %s1155_s8 = int_to_ptr.vmem [resolvable:$true] %s1154_s8 }
  0xa7   : > { %851 = vrot.lane.b32.xlu1 %v292_v17, %s1452_s9 }
  0xa8   : > { %758 = vrot.lane.b32.xlu0 %v303_v18, %s1453_s10 }
  0xab   : > { %756 = vrot.lane.b32.xlu1 %v302_v19, %s1453_s10  ;;  %s1384_s10 = scalar_lea.vmem %s1155_s8, 256 }
  0xac   : > { %486 = vrot.lane.b32.xlu0 %v304_v16, %s1454_s11  ;;  %p1385_p11 = scmp.ne.s32.totalorder %s1155_s8, %s1384_s10 }
  0xae   : > { %p1386_p12 = pnand %p1385_p11, %p1522_p5 }
  0xaf   : > { %940 = vrot.lane.b32.xlu1 %v288_v14, %s1455_s12 }
  0xb0   : > { %849 = vrot.lane.b32.xlu0 %v291_v20, %s1452_s9  ;;  %s1132_s9 = scalar_lea.sflag [#allocation4], %s189_s23  ;;  %p1387_p13 = pneg %p1386_p12 }
  0xb3   : > { %482 = vrot.lane.b32.xlu1 %v302_v19, %s1454_s11 }
  0xb4   : > { %942 = vrot.lane.b32.xlu0 %v236_v8, %s1455_s12 }
  0xb7   : > { %484 = vrot.lane.b32.xlu1 %v303_v18, %s1454_s11  ;;  %s1458_s11 = smov [#allocation3]  }
  0xb8   : > { %938 = vrot.lane.b32.xlu0 %v235_v9, %s1455_s12  ;;  %s1388_s12 = sshll.u32 %s1458_s11, 4  ;;  %s1389_s12 = int_to_ptr.vmem [resolvable:$false] %s1388_s12 }
  0xb9   : > { %p1391_p0 = scmp.lt.s32.totalorder %s1155_s8, %s1389_s12 }
  0xbb   : > { %576 = vrot.lane.b32.xlu1 %v291_v20, %s1456_s13 }
  0xbc   : > { %578 = vrot.lane.b32.xlu0 %v292_v17, %s1456_s13 }
  0xbf   : > { %1031 = vrot.lane.b32.xlu1 %v303_v18, %s1457_s14 }
  0xc0   : > { %1033 = vrot.lane.b32.xlu0 %v304_v16, %s1457_s14 }
  0xc3   : > { %574 = vrot.lane.b32.xlu1 %v1546_v11, %s1456_s13  ;;  %s1390_s13 = scalar_lea.vmem %s1389_s12, 512 }
  0xc4   : > { %1029 = vrot.lane.b32.xlu0 %v302_v19, %s1457_s14  ;;  %p1392_p1 = scmp.lt.s32.totalorder %s1390_s13, %s1384_s10 }
  0xc6   : > { %p1393_p2 = por %p1392_p1, %p1391_p0 }
  0xc8   : > { %p1394_p3 = pnand %p1393_p2, %p1387_p13 }
 0x109   : > { %v670_v21 = vpop.permute.xlu1 %669 }
 0x10a   : > { %v309_v22 = vpop.permute.xlu0 %308 }
 0x10d   : > { %v313_v23 = vpop.permute.xlu1 %312 }
 0x10e   : > { %v848_v24 = vpop.permute.xlu0 %847 }
 0x111   : > { %v666_v25 = vpop.permute.xlu1 %665 }
 0x112   : > { %v668_v26 = vpop.permute.xlu0 %667 }
 0x113   : > { %v673_v27 = vsel %vm671_vm12, %v668_v26, %v670_v21  ;;  %v672_v28 = vsel %vm671_vm12, %v666_v25, %v668_v26 }
 0x114   : > { %1292 = vmatprep.subr.msk.mxu0 %vm321_vm13, %v673_v27 }
 0x115   : > { %v761_v30 = vpop.permute.xlu1 %760  ;;  %1293 = vmatpush1.msk.msra.mxu0 %vm321_vm13, %v672_v28 }
 0x116   : > { %v311_v31 = vpop.permute.xlu0 %310  ;;  %1294 = vmatmul.mubr.msk.f32.vlgmr.msra.gmra.mrb[0].mxu0 %vm317_vm14, %v1291_v29 }
 0x117   : > { %v316_v32 = vsel %vm314_vm15, %v311_v31, %v313_v23  ;;  %v315_v33 = vsel %vm314_vm15, %v309_v22, %v311_v31  ;;  %836 = vmatprep.mubr.f32.mxu0 %v1448_v0 }
 0x118   : > { %1277 = vmatprep.subr.msk.mxu1 %vm321_vm13, %v316_v32 }
 0x119   : > { %v852_v35 = vpop.permute.xlu1 %851  ;;  %1278 = vmatpush1.msk.msra.mxu1 %vm321_vm13, %v315_v33 }
 0x11a   : > { %v759_v36 = vpop.permute.xlu0 %758  ;;  %1280 = vmatprep.subr.msk.mxu1 %vm321_vm13, %v291_v20  ;;  %1279 = vmatmul.mubr.msk.f32.vlgmr.msra.gmra.mrb[0].mxu1 %vm317_vm14, %v1276_v34 }
 0x11b   : > { %v764_v37 = vsel %vm762_vm0, %v759_v36, %v761_v30  ;;  %1281 = vmatpush1.msk.msra.mxu1 %vm321_vm13, %v1546_v11  ;;  %470 = vmatprep.mubr.f32.mxu1 %v1448_v0 }
 0x11c   : > { %1296 = vmatprep.subr.msk.mxu0 %vm321_vm13, %v764_v37 }
 0x11d   : > { %v757_v38 = vpop.permute.xlu1 %756 }
 0x11e   : > { %v763_v40 = vsel %vm762_vm0, %v757_v38, %v759_v36  ;;  %v487_v41 = vpop.permute.xlu0 %486 }
 0x11f   : > { %1297 = vmatpush1.msk.msra.mxu0 %vm321_vm13, %v763_v40 }
 0x120   : > { %1298 = vmatmul.mubr.msk.f32.vlgmr.msra.gmra.mrb[0].mxu0 %vm317_vm14, %v1295_v39 }
 0x121   : > { %v941_v43 = vpop.permute.xlu1 %940  ;;  %927 = vmatprep.mubr.f32.mxu0 %v1448_v0 }
 0x122   : > { %v850_v44 = vpop.permute.xlu0 %849  ;;  %1282 = vmatmul.mubr.msk.f32.vlgmr.msra.gmra.mrb[0].mxu1 %vm317_vm14, %v305_v42 }
 0x123   : > { %v854_v45 = vsel %vm853_vm1, %v848_v24, %v850_v44  ;;  %v855_v46 = vsel %vm853_vm1, %v850_v44, %v852_v35  ;;  %562 = vmatprep.mubr.f32.mxu1 %v1448_v0 }
 0x124   : > { %1300 = vmatprep.subr.msk.mxu0 %vm321_vm13, %v855_v46 }
 0x125   : > { %v483_v47 = vpop.permute.xlu1 %482  ;;  %1301 = vmatpush1.msk.msra.mxu0 %vm321_vm13, %v854_v45 }
 0x126   : > { %v943_v49 = vpop.permute.xlu0 %942 }
 0x127   : > { %v946_v50 = vsel %vm944_vm2, %v941_v43, %v943_v49 }
 0x128   : > { %1304 = vmatprep.subr.msk.mxu0 %vm321_vm13, %v946_v50  ;;  %1302 = vmatmul.mubr.msk.f32.vlgmr.msra.gmra.mrb[0].mxu0 %vm317_vm14, %v1299_v48 }
 0x129   : > { %v485_v51 = vpop.permute.xlu1 %484  ;;  %1018 = vmatprep.mubr.f32.mxu0 %v1448_v0 }
 0x12a   : > { %v489_v52 = vsel %vm488_vm3, %v483_v47, %v485_v51  ;;  %v490_v53 = vsel %vm488_vm3, %v485_v51, %v487_v41  ;;  %v939_v54 = vpop.permute.xlu0 %938 }
 0x12b   : > { %v945_v56 = vsel %vm944_vm2, %v939_v54, %v941_v43  ;;  %1284 = vmatprep.subr.msk.mxu1 %vm321_vm13, %v490_v53 }
 0x12c   : > { %1285 = vmatpush1.msk.msra.mxu1 %vm321_vm13, %v489_v52  ;;  %1305 = vmatpush1.msk.msra.mxu0 %vm321_vm13, %v945_v56 }
 0x12d   : > { %v577_v57 = vpop.permute.xlu1 %576  ;;  %1286 = vmatmul.mubr.msk.f32.vlgmr.msra.gmra.mrb[0].mxu1 %vm317_vm14, %v1283_v55 }
 0x12e   : > { %v579_v59 = vpop.permute.xlu0 %578  ;;  %654 = vmatprep.mubr.f32.mxu1 %v1448_v0 }
 0x12f   : > { %v582_v60 = vsel %vm580_vm4, %v577_v57, %v579_v59 }
 0x130   : > { %1288 = vmatprep.subr.msk.mxu1 %vm321_vm13, %v582_v60  ;;  %1306 = vmatmul.mubr.msk.f32.vlgmr.msra.gmra.mrb[0].mxu0 %vm317_vm14, %v1303_v58 }
 0x131   : > { %v1032_v61 = vpop.permute.xlu1 %1031  ;;  %1109 = vmatprep.mubr.f32.mxu0 %v1448_v0 }
 0x132   : > { %v1034_v62 = vpop.permute.xlu0 %1033 }
 0x133   : > { %v1037_v63 = vsel %vm1035_vm5, %v1032_v61, %v1034_v62 }
 0x134   : > { %1308 = vmatprep.subr.msk.mxu0 %vm321_vm13, %v1037_v63 }
 0x135   : > { %v575_v1 = vpop.permute.xlu1 %574 }
 0x136   : > { %v581_v3 = vsel %vm580_vm4, %v575_v1, %v577_v57  ;;  %v1030_v4 = vpop.permute.xlu0 %1029 }
 0x137   : > { %v1036_v6 = vsel %vm1035_vm5, %v1030_v4, %v1032_v61  ;;  %1289 = vmatpush1.msk.msra.mxu1 %vm321_vm13, %v581_v3 }
 0x138   : > { %1290 = vmatmul.mubr.msk.f32.vlgmr.msra.gmra.mrb[0].mxu1 %vm317_vm14, %v1287_v2  ;;  %1309 = vmatpush1.msk.msra.mxu0 %vm321_vm13, %v1036_v6 }
 0x139   : > { %1310 = vmatmul.mubr.msk.f32.vlgmr.msra.gmra.mrb[0].mxu0 %vm317_vm14, %v1307_v5 }
 0x20b   : > { %v656_v0 = vpop.f32.mrb[0].mxu1 }
 0x20c   : > { %v658_v7 = vpop.f32.mrb[1].mxu1  ;;  %v1111_v8 = vpop.f32.mrb[0].mxu0 }
 0x20d   : > { %v1318_v9 = vadd.f32 %v1111_v8, %v656_v0  ;;  %v1113_v10 = vpop.f32.mrb[1].mxu0 }
 0x20e   : > { %v1319_v11 = vadd.f32 %v1113_v10, %v658_v7 }
 0x20f   : > { %1118 = vst [vmem:[%s191_s29] sm:$0xff] %v1318_v9  ;;  %v1125_v12 = vmul.f32 %v1318_v9, %v1318_v9 }
 0x210   : > { %1119 = vst [vmem:[%s191_s29 + $0x8] sm:$0xff] %v1319_v11  ;;  %v1120_v13 = vadd.f32 %v1319_v11, %v1318_v9  ;;  %v1126_v14 = vmul.f32 %v1319_v11, %v1319_v11 }
 0x212   : > { %1121 = vadd.xlane.f32.xlu1 %v1120_v13  ;;  %v1127_v15 = vadd.f32 %v1126_v14, %v1125_v12 }
 0x214   : > { %1128 = vadd.xlane.f32.xlu0 %v1127_v15 }
 0x215   : > { %1397 = shalt.err (!%p1394_p3)
}
 0x216   : > { %s1398_s19 = scalar_lea.hbm %s1619_s7, 256  ;;  %s1402_s22 = scalar_lea.hbm %s1665_s2, 512 }
 0x217   : > { %p1399_p4 = scmp.ne.s32.totalorder %s1619_s7, %s1398_s19  ;;  %p1403_p9 = scmp.lt.u32.totalorder %s1619_s7, %s1665_s2 }
 0x218   : > { %p1404_p10 = scmp.lt.u32.totalorder %s1402_s22, %s1398_s19  ;;  %p1406_p12 = scmp.lt.u32.totalorder %s1398_s19, %s1619_s7 }
 0x219   : > { %p1400_p7 = pnand %p1399_p4, %p1522_p5 }
 0x21a   : > { %p1405_p11 = por %p1404_p10, %p1403_p9 }
 0x21b   : > { %p1401_p8 = pneg %p1400_p7 }
 0x21c   : > { %p1407_p13 = por %p1406_p12, %p1405_p11 }
 0x21e   : > { %p1408_p0 = pnand %p1407_p13, %p1401_p8 }
 0x220   : > { %1411 = shalt.err (!%p1408_p0)
}
 0x221   : > { %1334 = dma.vmem_to_hbm [thread:$0]  (%p1522_p5), %s1155_s8, 256, %s1619_s7, %s1132_s9   ;;  %vm1123_vm6 = vcmask 7168  }
 0x222   : > { %s212_s5 = scalar_lea.vmem %s1666_s3, %s1539_s28  ;;  %s216_s11 = scalar_lea.vmem %s1667_s4, %s1539_s28 }
 0x29f   : > { %v1122_v16 = vpop.xlane.xlu1 %1121 }
 0x2a0   : > { %1124 = vst.msk [vmem:[%s212_s5] sm:$0xff] %vm1123_vm6, %v1122_v16 }
 0x2a1   : > { %v1129_v17 = vpop.xlane.xlu0 %1128 }
 0x2a2   : > { %1130 = vst.msk [vmem:[%s216_s11] sm:$0xff] %vm1123_vm6, %v1129_v17 }
 0x2a3 PF: > { %p1340_p1 = scmp.ge.s32.totalorder %s1446_s18, 2  ;;  %s1172_s25 = sand.u32 1, %s1434_s15  }
 0x2a4   : > { %s1173_s7 = scalar_lea.sflag [#allocation4], %s1172_s25 }
 0x2a5   : > { %p1337_p5 = pnand %p1340_p1, %p1526_p6 }
 0x2a7   : > { %1429 = dma.done.wait (!%p1337_p5), %s1173_s7, 256  }
 0x2a8   : > { %1431 = vsyncadd (!%p1337_p5), %s1173_s7, 4294967040  ;;  %p15_p2 = scmp.ge.s32.totalorder %s1509_s21, 4   ;;  %s1670_s15 = smov %s1438_s16 }
 0x2a9   : > { %s1671_s16 = smov %s1442_s17  ;;  %s1672_s17 = smov %s1520_s24 }
 0x2aa   : > { %s1673_s18 = smov %s1509_s21  ;;  %17 = sbr.rel (!%p15_p2) target bundleno = 3 (0x3), region = 95 }
 0x2b1   :  { %1192 = vsyncpa [#allocation4], 1 }
 0x2b2   :  { %1194 = vsyncpa [#allocation4 + $0x1], 1 }

</bundles_post_ra>
